<compile_context>
chip_gen: v5e
topology: v5e:2x2
jax: 0.10.0
libtpu: 0.0.40
codegen_flags: <defaults>
</compile_context>

<pallas_src>
import functools
import math

import jax
import jax.numpy as jnp
from jax.experimental import pallas as pl
from jax.experimental.pallas import tpu as pltpu


# ---------------------------------------------------------------------------
# Network layout: (fan_in, fan_out) per Linear (PyTorch order).
# ---------------------------------------------------------------------------
LAYER_DIMS = (
    (12, 10), (10, 10), (10, 6),    # encoder
    (6, 10), (10, 10), (10, 12),    # decoder
    (24, 10), (10, 8), (8, 5),      # mlp head
)
N_LAYERS = len(LAYER_DIMS)
IN_DIM = 12
N_CLASSES = 5
ROWS_PER_LAYER = 16                 # sublane-aligned chunk per layer (max fan_out = 12)
BIAS_LANE = 32                      # max fan_in is 24, so lane 32 is always free
SLAB_ROWS = N_LAYERS * ROWS_PER_LAYER   # 144
SLAB_LANES = 128


# ---------------------------------------------------------------------------
# Kernel (transposed dataflow: activations are [features, tb], batch on lanes)
# ---------------------------------------------------------------------------
def _layer(params_ref, h, idx, relu):
    """W^T_idx @ h + b_idx (optionally ReLU), reading W^T/b from the packed slab."""
    fan_in, fan_out = LAYER_DIMS[idx]
    r0 = idx * ROWS_PER_LAYER
    w = params_ref[r0:r0 + fan_out, 0:fan_in]                    # [out, in] == W^T
    b = params_ref[r0:r0 + fan_out, BIAS_LANE:BIAS_LANE + 1]     # [out, 1]
    y = jnp.dot(w, h, preferred_element_type=jnp.float32) + b    # [out, tb]
    return jnp.maximum(y, 0.0) if relu else y


def dae_kernel(x_ref, noise_ref, params_ref, scale_ref, out_ref):
    x = x_ref[...]                                               # [12, tb] f32
    # noise * 0.01 + x  (noise is host-side N(0,1); lane-dense add)
    inp = x + scale_ref[0] * noise_ref[...]

    # ---- encoder: Lin(12,10) ReLU [Drop] Lin(10,10) [Drop] ReLU Lin(10,6) ----
    h = _layer(params_ref, inp, 0, relu=True)
    h = _layer(params_ref, h, 1, relu=True)
    enc = _layer(params_ref, h, 2, relu=False)                   # [6, tb]

    # ---- decoder: Lin(6,10) ReLU [Drop] Lin(10,10) ReLU [Drop] Lin(10,12) ----
    d = _layer(params_ref, enc, 3, relu=True)
    d = _layer(params_ref, d, 4, relu=True)
    dec = _layer(params_ref, d, 5, relu=False)                   # [12, tb]

    # ---- mlp head: W6 @ cat([dec, x], 0) == W6[:, :12] @ dec + W6[:, 12:24] @ x ----
    r6 = 6 * ROWS_PER_LAYER
    w_dec = params_ref[r6:r6 + 10, 0:12]
    w_x = params_ref[r6:r6 + 10, 12:24]
    b6 = params_ref[r6:r6 + 10, BIAS_LANE:BIAS_LANE + 1]
    m = (jnp.dot(w_dec, dec, preferred_element_type=jnp.float32)
         + jnp.dot(w_x, x, preferred_element_type=jnp.float32) + b6)
    m = jnp.maximum(m, 0.0)
    m = _layer(params_ref, m, 7, relu=True)
    logits = _layer(params_ref, m, 8, relu=False)                # [5, tb]

    # ---- softmax over the feature (sublane) axis; exact normalization ----
    z = logits - jnp.max(logits, axis=0, keepdims=True)
    e = jnp.exp(z)
    out_ref[...] = e / jnp.sum(e, axis=0, keepdims=True)         # lane-dense store


# ---------------------------------------------------------------------------
# Host-side wrapper
# ---------------------------------------------------------------------------
@functools.partial(jax.jit, static_argnames=("tb",))
def dae_forward(x, noise, params_slab, noise_scale, *, tb=2048):
    """x, noise: (B, 12) f32.  Returns softmax probabilities (B, 5) f32."""
    B = x.shape[0]

    # Batch tile: multiple of 128 (lane axis), and >= 2 tiles whenever the batch
    # allows it so v7x megacore ("parallel") can use both TensorCores.
    cap = B if B <= 128 else -(-B // 2)
    tb = max(128, (min(tb, cap) // 128) * 128)
    grid_b = -(-B // tb)
    Bp = grid_b * tb

    # Transpose to batch-on-lanes layout; pad the batch (lane) axis.
    xt = jnp.transpose(x)                                        # (12, B)
    nt = jnp.transpose(noise)
    if Bp != B:
        pad = ((0, 0), (0, Bp - B))
        xt = jnp.pad(xt, pad)
        nt = jnp.pad(nt, pad)

    out_t = pl.pallas_call(
        dae_kernel,
        out_shape=jax.ShapeDtypeStruct((N_CLASSES, Bp), jnp.float32),
        grid=(grid_b,),
        in_specs=[
            pl.BlockSpec((IN_DIM, tb), lambda i: (0, i)),              # x tiles
            pl.BlockSpec((IN_DIM, tb), lambda i: (0, i)),              # noise tiles
            pl.BlockSpec((SLAB_ROWS, SLAB_LANES), lambda i: (0, 0)),   # resident params
            pl.BlockSpec(memory_space=pltpu.MemorySpace.SMEM),         # noise scale (1,) f32
        ],
        out_specs=pl.BlockSpec((N_CLASSES, tb), lambda i: (0, i)),
        compiler_params=pltpu.CompilerParams(
            dimension_semantics=("parallel",)),                        # v7x: 2 TCs
    )(xt, nt, params_slab, noise_scale)

    return jnp.transpose(out_t[:, :B])                                 # (B, 5)


# ---------------------------------------------------------------------------
# Parameter construction / packing / pure-JAX reference
# ---------------------------------------------------------------------------
def init_params(key):
    """Deterministic synthetic params (xavier-normal W, N(0,1) bias), W as [in, out]."""
    params = []
    for fan_in, fan_out in LAYER_DIMS:
        key, kw, kb = jax.random.split(key, 3)
        std = math.sqrt(2.0 / (fan_in + fan_out))
        w = jax.random.normal(kw, (fan_in, fan_out), jnp.float32) * std
        b = jax.random.normal(kb, (fan_out,), jnp.float32)
        params.append((w, b))
    return params


def pack_params(params):
    """Pack all W^T / biases into one (144, 128) f32 slab (single resident DMA)."""
    slab = jnp.zeros((SLAB_ROWS, SLAB_LANES), jnp.float32)
    for idx, (w, b) in enumerate(params):
        fan_in, fan_out = w.shape
        r0 = idx * ROWS_PER_LAYER
        slab = slab.at[r0:r0 + fan_out, :fan_in].set(w.T)        # W^T: [out, in]
        slab = slab.at[r0:r0 + fan_out, BIAS_LANE].set(b)
    return slab


def dae_reference(x, noise, scale, params):
    """Pure-JAX reference (dropout = identity), same host-side noise."""
    hp = jax.lax.Precision.HIGHEST

    def lin(h, idx):
        w, b = params[idx]
        return jnp.dot(h, w, precision=hp) + b

    inp = x + scale * noise
    h = jax.nn.relu(lin(inp, 0))
    h = jax.nn.relu(lin(h, 1))
    enc = lin(h, 2)
    d = jax.nn.relu(lin(enc, 3))
    d = jax.nn.relu(lin(d, 4))
    dec = lin(d, 5)
    cat = jnp.concatenate([dec, x], axis=1)
    m = jax.nn.relu(lin(cat, 6))
    m = jax.nn.relu(lin(m, 7))
    logits = lin(m, 8)
    return jax.nn.softmax(logits, axis=1)


# ---------------------------------------------------------------------------
if __name__ == "__main__":
    key = jax.random.PRNGKey(0)
    k_params, k_x, k_noise, k_x2, k_n2 = jax.random.split(key, 5)

    params = init_params(k_params)
    slab = pack_params(params)
    scale = jnp.array([0.01], jnp.float32)          # module semantics: noise * 0.01 + x

    # 1) exact-parity check (same host noise, scale 0.01) against the pure-JAX reference.
    B = 256                                          # -> 2 batch tiles of 128 lanes
    x = jax.random.normal(k_x, (B, 12), jnp.float32)
    noise = jax.random.normal(k_noise, (B, 12), jnp.float32)
    out = dae_forward(x, noise, slab, scale)
    jax.block_until_ready(out)
    ref = dae_reference(x, noise, 0.01, params)
    assert out.shape == (B, 5)
    max_err = float(jnp.max(jnp.abs(out - ref)))
    assert max_err < 2e-3, f"kernel vs reference mismatch: {max_err}"
    row_sums = jnp.sum(out, axis=1)
    assert bool(jnp.all(jnp.abs(row_sums - 1.0) < 1e-3))
    assert bool(jnp.all(jnp.isfinite(out)))

    # 2) ragged batch (exercises lane-axis padding + slicing): B=300 -> 3 tiles of 128.
    B2 = 300
    x2 = jax.random.normal(k_x2, (B2, 12), jnp.float32)
    n2 = jax.random.normal(k_n2, (B2, 12), jnp.float32)
    out2 = dae_forward(x2, n2, slab, scale)
    jax.block_until_ready(out2)
    ref2 = dae_reference(x2, n2, 0.01, params)
    assert out2.shape == (B2, 5)
    assert float(jnp.max(jnp.abs(out2 - ref2))) < 2e-3
    assert bool(jnp.all(jnp.abs(jnp.sum(out2, axis=1) - 1.0) < 1e-3))

    print("KERNEL_OK")
</pallas_src>

<mosaic_0001>
module attributes {stable_mosaic.version = 11 : i64} {
  func.func @dae_kernel(%arg0: i32, %arg1: memref<12x128xf32, #tpu.memory_space<vmem>>, %arg2: memref<12x128xf32, #tpu.memory_space<vmem>>, %arg3: memref<144x128xf32, #tpu.memory_space<vmem>>, %arg4: memref<1xf32, #tpu.memory_space<smem>>, %arg5: memref<5x128xf32, #tpu.memory_space<vmem>>) attributes {dimension_semantics = [#tpu.dimension_semantics<parallel>], iteration_bounds = array<i64: 2>, scalar_prefetch = 0 : i64, scratch_operands = 0 : i64, tpu.core_type = #tpu.core_type<tc>, window_params = [{transform_indices = @transform_0, window_bounds = array<i64: 12, 128>}, {transform_indices = @transform_1, window_bounds = array<i64: 12, 128>}, {pipeline_mode = #tpu.pipeline_mode<synchronous>, transform_indices = @transform_2, window_bounds = array<i64: 144, 128>}, {transform_indices = @transform_3, window_bounds = array<i64: 1>}, {transform_indices = @transform_4, window_bounds = array<i64: 5, 128>}]} {
    %c0 = arith.constant 0 : index
    %c0_0 = arith.constant 0 : index
    %0 = vector.load %arg1[%c0, %c0_0] : memref<12x128xf32, #tpu.memory_space<vmem>>, vector<12x128xf32>
    %c0_1 = arith.constant 0 : index
    %1 = memref.load %arg4[%c0_1] : memref<1xf32, #tpu.memory_space<smem>>
    %c0_2 = arith.constant 0 : index
    %c0_3 = arith.constant 0 : index
    %2 = vector.load %arg2[%c0_2, %c0_3] : memref<12x128xf32, #tpu.memory_space<vmem>>, vector<12x128xf32>
    %3 = vector.broadcast %1 : f32 to vector<12x128xf32>
    %4 = arith.mulf %3, %2 : vector<12x128xf32>
    %5 = arith.addf %0, %4 : vector<12x128xf32>
    %c0_4 = arith.constant 0 : index
    %c0_5 = arith.constant 0 : index
    %6 = vector.load %arg3[%c0_4, %c0_5] : memref<144x128xf32, #tpu.memory_space<vmem>>, vector<10x12xf32>
    %c0_6 = arith.constant 0 : index
    %c32 = arith.constant 32 : index
    %7 = vector.load %arg3[%c0_6, %c32] : memref<144x128xf32, #tpu.memory_space<vmem>>, vector<10x1xf32>
    %cst = arith.constant dense<0.000000e+00> : vector<10x128xf32>
    %8 = tpu.matmul %6, %5, %cst {dimension_numbers = #tpu.dot_dimension_numbers<[1], [0], [0], [1], [0, 0, 1, 1], [], []>} : vector<10x12xf32>, vector<12x128xf32>, vector<10x128xf32> -> vector<10x128xf32>
    %9 = vector.broadcast %7 : vector<10x1xf32> to vector<10x128xf32>
    %10 = arith.addf %8, %9 : vector<10x128xf32>
    %cst_7 = arith.constant 0.000000e+00 : f32
    %11 = vector.broadcast %cst_7 : f32 to vector<10x128xf32>
    %12 = arith.maximumf %10, %11 : vector<10x128xf32>
    %c16 = arith.constant 16 : index
    %c0_8 = arith.constant 0 : index
    %13 = vector.load %arg3[%c16, %c0_8] : memref<144x128xf32, #tpu.memory_space<vmem>>, vector<10x10xf32>
    %c16_9 = arith.constant 16 : index
    %c32_10 = arith.constant 32 : index
    %14 = vector.load %arg3[%c16_9, %c32_10] : memref<144x128xf32, #tpu.memory_space<vmem>>, vector<10x1xf32>
    %cst_11 = arith.constant dense<0.000000e+00> : vector<10x128xf32>
    %15 = tpu.matmul %13, %12, %cst_11 {dimension_numbers = #tpu.dot_dimension_numbers<[1], [0], [0], [1], [0, 0, 1, 1], [], []>} : vector<10x10xf32>, vector<10x128xf32>, vector<10x128xf32> -> vector<10x128xf32>
    %16 = vector.broadcast %14 : vector<10x1xf32> to vector<10x128xf32>
    %17 = arith.addf %15, %16 : vector<10x128xf32>
    %cst_12 = arith.constant 0.000000e+00 : f32
    %18 = vector.broadcast %cst_12 : f32 to vector<10x128xf32>
    %19 = arith.maximumf %17, %18 : vector<10x128xf32>
    %c32_13 = arith.constant 32 : index
    %c0_14 = arith.constant 0 : index
    %20 = vector.load %arg3[%c32_13, %c0_14] : memref<144x128xf32, #tpu.memory_space<vmem>>, vector<6x10xf32>
    %c32_15 = arith.constant 32 : index
    %c32_16 = arith.constant 32 : index
    %21 = vector.load %arg3[%c32_15, %c32_16] : memref<144x128xf32, #tpu.memory_space<vmem>>, vector<6x1xf32>
    %cst_17 = arith.constant dense<0.000000e+00> : vector<6x128xf32>
    %22 = tpu.matmul %20, %19, %cst_17 {dimension_numbers = #tpu.dot_dimension_numbers<[1], [0], [0], [1], [0, 0, 1, 1], [], []>} : vector<6x10xf32>, vector<10x128xf32>, vector<6x128xf32> -> vector<6x128xf32>
    %23 = vector.broadcast %21 : vector<6x1xf32> to vector<6x128xf32>
    %24 = arith.addf %22, %23 : vector<6x128xf32>
    %c48 = arith.constant 48 : index
    %c0_18 = arith.constant 0 : index
    %25 = vector.load %arg3[%c48, %c0_18] : memref<144x128xf32, #tpu.memory_space<vmem>>, vector<10x6xf32>
    %c48_19 = arith.constant 48 : index
    %c32_20 = arith.constant 32 : index
    %26 = vector.load %arg3[%c48_19, %c32_20] : memref<144x128xf32, #tpu.memory_space<vmem>>, vector<10x1xf32>
    %cst_21 = arith.constant dense<0.000000e+00> : vector<10x128xf32>
    %27 = tpu.matmul %25, %24, %cst_21 {dimension_numbers = #tpu.dot_dimension_numbers<[1], [0], [0], [1], [0, 0, 1, 1], [], []>} : vector<10x6xf32>, vector<6x128xf32>, vector<10x128xf32> -> vector<10x128xf32>
    %28 = vector.broadcast %26 : vector<10x1xf32> to vector<10x128xf32>
    %29 = arith.addf %27, %28 : vector<10x128xf32>
    %cst_22 = arith.constant 0.000000e+00 : f32
    %30 = vector.broadcast %cst_22 : f32 to vector<10x128xf32>
    %31 = arith.maximumf %29, %30 : vector<10x128xf32>
    %c64 = arith.constant 64 : index
    %c0_23 = arith.constant 0 : index
    %32 = vector.load %arg3[%c64, %c0_23] : memref<144x128xf32, #tpu.memory_space<vmem>>, vector<10x10xf32>
    %c64_24 = arith.constant 64 : index
    %c32_25 = arith.constant 32 : index
    %33 = vector.load %arg3[%c64_24, %c32_25] : memref<144x128xf32, #tpu.memory_space<vmem>>, vector<10x1xf32>
    %cst_26 = arith.constant dense<0.000000e+00> : vector<10x128xf32>
    %34 = tpu.matmul %32, %31, %cst_26 {dimension_numbers = #tpu.dot_dimension_numbers<[1], [0], [0], [1], [0, 0, 1, 1], [], []>} : vector<10x10xf32>, vector<10x128xf32>, vector<10x128xf32> -> vector<10x128xf32>
    %35 = vector.broadcast %33 : vector<10x1xf32> to vector<10x128xf32>
    %36 = arith.addf %34, %35 : vector<10x128xf32>
    %cst_27 = arith.constant 0.000000e+00 : f32
    %37 = vector.broadcast %cst_27 : f32 to vector<10x128xf32>
    %38 = arith.maximumf %36, %37 : vector<10x128xf32>
    %c80 = arith.constant 80 : index
    %c0_28 = arith.constant 0 : index
    %39 = vector.load %arg3[%c80, %c0_28] : memref<144x128xf32, #tpu.memory_space<vmem>>, vector<12x10xf32>
    %c80_29 = arith.constant 80 : index
    %c32_30 = arith.constant 32 : index
    %40 = vector.load %arg3[%c80_29, %c32_30] : memref<144x128xf32, #tpu.memory_space<vmem>>, vector<12x1xf32>
    %cst_31 = arith.constant dense<0.000000e+00> : vector<12x128xf32>
    %41 = tpu.matmul %39, %38, %cst_31 {dimension_numbers = #tpu.dot_dimension_numbers<[1], [0], [0], [1], [0, 0, 1, 1], [], []>} : vector<12x10xf32>, vector<10x128xf32>, vector<12x128xf32> -> vector<12x128xf32>
    %42 = vector.broadcast %40 : vector<12x1xf32> to vector<12x128xf32>
    %43 = arith.addf %41, %42 : vector<12x128xf32>
    %c96 = arith.constant 96 : index
    %c0_32 = arith.constant 0 : index
    %44 = vector.load %arg3[%c96, %c0_32] : memref<144x128xf32, #tpu.memory_space<vmem>>, vector<10x12xf32>
    %c96_33 = arith.constant 96 : index
    %c12 = arith.constant 12 : index
    %45 = vector.load %arg3[%c96_33, %c12] : memref<144x128xf32, #tpu.memory_space<vmem>>, vector<10x12xf32>
    %c96_34 = arith.constant 96 : index
    %c32_35 = arith.constant 32 : index
    %46 = vector.load %arg3[%c96_34, %c32_35] : memref<144x128xf32, #tpu.memory_space<vmem>>, vector<10x1xf32>
    %cst_36 = arith.constant dense<0.000000e+00> : vector<10x128xf32>
    %47 = tpu.matmul %44, %43, %cst_36 {dimension_numbers = #tpu.dot_dimension_numbers<[1], [0], [0], [1], [0, 0, 1, 1], [], []>} : vector<10x12xf32>, vector<12x128xf32>, vector<10x128xf32> -> vector<10x128xf32>
    %cst_37 = arith.constant dense<0.000000e+00> : vector<10x128xf32>
    %48 = tpu.matmul %45, %0, %cst_37 {dimension_numbers = #tpu.dot_dimension_numbers<[1], [0], [0], [1], [0, 0, 1, 1], [], []>} : vector<10x12xf32>, vector<12x128xf32>, vector<10x128xf32> -> vector<10x128xf32>
    %49 = arith.addf %47, %48 : vector<10x128xf32>
    %50 = vector.broadcast %46 : vector<10x1xf32> to vector<10x128xf32>
    %51 = arith.addf %49, %50 : vector<10x128xf32>
    %cst_38 = arith.constant 0.000000e+00 : f32
    %52 = vector.broadcast %cst_38 : f32 to vector<10x128xf32>
    %53 = arith.maximumf %51, %52 : vector<10x128xf32>
    %c112 = arith.constant 112 : index
    %c0_39 = arith.constant 0 : index
    %54 = vector.load %arg3[%c112, %c0_39] : memref<144x128xf32, #tpu.memory_space<vmem>>, vector<8x10xf32>
    %c112_40 = arith.constant 112 : index
    %c32_41 = arith.constant 32 : index
    %55 = vector.load %arg3[%c112_40, %c32_41] : memref<144x128xf32, #tpu.memory_space<vmem>>, vector<8x1xf32>
    %cst_42 = arith.constant dense<0.000000e+00> : vector<8x128xf32>
    %56 = tpu.matmul %54, %53, %cst_42 {dimension_numbers = #tpu.dot_dimension_numbers<[1], [0], [0], [1], [0, 0, 1, 1], [], []>} : vector<8x10xf32>, vector<10x128xf32>, vector<8x128xf32> -> vector<8x128xf32>
    %57 = vector.broadcast %55 : vector<8x1xf32> to vector<8x128xf32>
    %58 = arith.addf %56, %57 : vector<8x128xf32>
    %cst_43 = arith.constant 0.000000e+00 : f32
    %59 = vector.broadcast %cst_43 : f32 to vector<8x128xf32>
    %60 = arith.maximumf %58, %59 : vector<8x128xf32>
    %c128 = arith.constant 128 : index
    %c0_44 = arith.constant 0 : index
    %61 = vector.load %arg3[%c128, %c0_44] : memref<144x128xf32, #tpu.memory_space<vmem>>, vector<5x8xf32>
    %c128_45 = arith.constant 128 : index
    %c32_46 = arith.constant 32 : index
    %62 = vector.load %arg3[%c128_45, %c32_46] : memref<144x128xf32, #tpu.memory_space<vmem>>, vector<5x1xf32>
    %cst_47 = arith.constant dense<0.000000e+00> : vector<5x128xf32>
    %63 = tpu.matmul %61, %60, %cst_47 {dimension_numbers = #tpu.dot_dimension_numbers<[1], [0], [0], [1], [0, 0, 1, 1], [], []>} : vector<5x8xf32>, vector<8x128xf32>, vector<5x128xf32> -> vector<5x128xf32>
    %64 = vector.broadcast %62 : vector<5x1xf32> to vector<5x128xf32>
    %65 = arith.addf %63, %64 : vector<5x128xf32>
    %cst_48 = arith.constant dense<0xFF800000> : vector<128xf32>
    %66 = vector.multi_reduction <maximumf>, %65, %cst_48 [0] : vector<5x128xf32> to vector<128xf32>
    %67 = vector.shape_cast %66 : vector<128xf32> to vector<1x128xf32>
    %68 = vector.broadcast %67 : vector<1x128xf32> to vector<5x128xf32>
    %69 = arith.subf %65, %68 : vector<5x128xf32>
    %70 = math.exp %69 : vector<5x128xf32>
    %cst_49 = arith.constant dense<0.000000e+00> : vector<128xf32>
    %71 = vector.multi_reduction <add>, %70, %cst_49 [0] : vector<5x128xf32> to vector<128xf32>
    %72 = vector.shape_cast %71 : vector<128xf32> to vector<1x128xf32>
    %73 = vector.broadcast %72 : vector<1x128xf32> to vector<5x128xf32>
    %74 = arith.divf %70, %73 : vector<5x128xf32>
    %c0_50 = arith.constant 0 : index
    %c0_51 = arith.constant 0 : index
    %75 = vector.load %arg5[%c0_50, %c0_51] : memref<5x128xf32, #tpu.memory_space<vmem>>, vector<5x128xf32>
    tpu.vector_store %arg5[%c0_50, %c0_51], %74 {strides = array<i32>} : memref<5x128xf32, #tpu.memory_space<vmem>>, vector<5x128xf32>,
    return
  }
  func.func @transform_0(%arg0: i32) -> (i32, i32) {
    %c0_i32 = arith.constant 0 : i32
    %c0_i32_0 = arith.constant 0 : i32
    return %c0_i32, %arg0 : i32, i32
  }
  func.func @transform_1(%arg0: i32) -> (i32, i32) {
    %c0_i32 = arith.constant 0 : i32
    %c0_i32_0 = arith.constant 0 : i32
    return %c0_i32, %arg0 : i32, i32
  }
  func.func @transform_2(%arg0: i32) -> (i32, i32) {
    %c0_i32 = arith.constant 0 : i32
    %c0_i32_0 = arith.constant 0 : i32
    %c0_i32_1 = arith.constant 0 : i32
    return %c0_i32, %c0_i32_0 : i32, i32
  }
  func.func @transform_3(%arg0: i32) -> i32 {
    %c0_i32 = arith.constant 0 : i32
    %c0_i32_0 = arith.constant 0 : i32
    return %c0_i32 : i32
  }
  func.func @transform_4(%arg0: i32) -> (i32, i32) {
    %c0_i32 = arith.constant 0 : i32
    %c0_i32_0 = arith.constant 0 : i32
    return %c0_i32, %arg0 : i32, i32
  }
}

</mosaic_0001>

<bundles_post_ra>
// kernel: dae_forward.1
= control target key start
LH: loop header
LB: loop body
LE: loop exit
PB: predicated region body
PF: predicated region fallthrough
CT: control target
= control target key end

     0   :  { %s1378_s0 = inlined_call_operand.hbm [shape: f32[12,256], index: 0, kind: input, shape index: {}]   ;;  %s1379_s1 = inlined_call_operand.hbm [shape: f32[12,256], index: 1, kind: input, shape index: {}]   ;;  %s1380_s2 = inlined_call_operand.hbm [shape: f32[144,128], index: 2, kind: input, shape index: {}]   ;;  %s1381_s3 = inlined_call_operand.<no memory space> [shape: f32[1], index: 3, kind: input, shape index: {}]   ;;  %s1382_s4 = inlined_call_operand.hbm [shape: f32[5,256], index: 4, kind: output, shape index: {}]  }
   0x1   :  { %1387 = sst [smem:[#allocation15_spill]] %s1378_s0 }
   0x2   :  { %1388 = sst [smem:[#allocation16_spill]] %s1380_s2 }
   0x3   :  { %9 = sst [smem:[#allocation2]] %s1381_s3 }
   0x4   :  { %10 = vsyncpa [#allocation4], 0 }
   0x5   :  { %12 = vsyncpa [#allocation4 + $0x1], 0 }
   0x6   :  { %13 = vsyncpa [#allocation7], 0 }
   0x7   :  { %15 = vsyncpa [#allocation7 + $0x1], 0 }
   0x8   :  { %16 = vsyncpa [#allocation5], 0 }
   0x9   :  { %18 = vsyncpa [#allocation5 + $0x1], 0  ;;  %s1150_s17 = smov 0   ;;  %s1152_s18 = smov 0  }
   0xa   :  { %s1154_s19 = smov 0   ;;  %s1156_s20 = smov 0  }
   0xb LB: > { %s1171_s3 = sadd.s32 4294967295, %s1114_s20   ;;  %s833_s21 = sadd.s32 4294967294, %s1114_s20   ;;  %s1114_s20 = sphi %s1156_s20, %s1404_s20   ;;  %s1110_s19 = sphi %s1154_s19, %s1403_s19   ;;  %s1106_s18 = sphi %s1152_s18, %s1402_s18   ;;  %s1102_s17 = sphi %s1150_s17, %s1401_s17  }
   0xc   : > { %p44_p0 = scmp.ne.s32.totalorder %s1106_s18, %s1102_s17  ;;  %p45_p1 = scmp.eq.s32.totalorder %s1171_s3, 0 }
   0xd   : > { %p136_p2 = scmp.eq.s32.totalorder %s1171_s3, 1  ;;  %p142_p3 = scmp.eq.s32.totalorder %s833_s21, 1 }
   0xe   : > { %p1180_p4 = por %p45_p1, %p44_p0  ;;  %p834_p5 = scmp.ge.s32.totalorder %s1114_s20, 1 }
   0xf   : > { %p1185_p6 = por %p142_p3, %p44_p0  ;;  %p149_p7 = scmp.lt.s32.totalorder %s1114_s20, 3 }
  0x10   : > { %s1391_s2 = sld [smem:[#allocation16_spill]]  ;;  %s1116_s28 = smov [#allocation8]  }
  0x11   : > { %p1193_p8 = pnand %p834_p5, %p149_p7  ;;  %s162_s29 = sshll.u32 %s1116_s28, 4  ;;  %s163_s29 = int_to_ptr.vmem [resolvable:$true] %s162_s29 }
  0x12   : > { %s1203_s30 = sadd.s32 1, %s1114_s20   ;;  %s1383_s5 = smov 128  }
  0x13   : > { %p886_p9 = pneg %p1193_p8  ;;  %s1385_s6 = smov 8  }
  0x14   : > { %s28_s7 = ssub.s32 %s1114_s20, %s1203_s30  ;;  %s31_s8 = sadd.s32 1, %s1110_s19 }
  0x15   : > { %p887_p10 = pnand %p886_p9, %p45_p1  ;;  %p29_p12 = scmp.eq.s32.totalorder %s28_s7, 0 }
  0x16   : > { %s160_s26 = sshll.u32 %s1391_s2, 4  ;;  %p38_p13 = scmp.ne.s32.totalorder %s1110_s19, %s1106_s18  ;;  %s161_s26 = int_to_ptr.hbm [resolvable:$true] %s160_s26 }
  0x17   : > { %889 = dma.hbm_to_vmem [thread:$0]  (!%p887_p10), %s161_s26, 2304, %s163_s29, [#allocation7], %s1383_s5, %s1383_s5, %s1385_s6  }
  0x18   : > { %p39_p0 = scmp.eq.s32.totalorder %s1114_s20, 0  ;;  %p902_p3 = scmp.lt.s32.totalorder %s1114_s20, 2 }
  0x19   : > { %s1216_s9 = scalar_select %p29_p12, %s1110_s19, %s31_s8  }
  0x1a   : > { %p40_p5 = por %p39_p0, %p38_p13  ;;  %p1220_p7 = por %p136_p2, %p38_p13 }
  0x1b   : > { %1393 = sst [smem:[#allocation14_spill]] %s1216_s9  ;;  %s179_s11 = sand.u32 1, %s1110_s19  }
  0x1c   : > { %s838_s12 = sshll.u32 %s1114_s20, 3  ;;  %s1226_s13 = sshll.u32 %s179_s11, 4 }
  0x1d   : > { %s1395_s0 = sld [smem:[#allocation15_spill]]  ;;  %s183_s24 = scalar_lea.vmem [#allocation3], %s1226_s13 }
  0x1e   : > { %s190_s25 = sshll.u32 %s183_s24, 4  ;;  %p1234_p9 = pnand %p902_p3, %p40_p5  ;;  %s191_s25 = int_to_ptr.vmem [resolvable:$true] %s190_s25 }
  0x1f   : > { %s208_s7 = scalar_lea.hbm %s1379_s1, %s838_s12  ;;  %s180_s14 = scalar_lea.sflag [#allocation4], %s179_s11 }
  0x20   : > { %s209_s8 = sshll.u32 %s208_s7, 4  ;;  %p984_p10 = pneg %p1234_p9  ;;  %s210_s8 = int_to_ptr.hbm [resolvable:$true] %s209_s8 }
  0x23   : > { %s187_s16 = scalar_lea.hbm %s1395_s0, %s838_s12  ;;  %s987_s6 = scalar_lea.hbm %s1395_s0, 32 }
  0x24   : > { %s188_s21 = sshll.u32 %s187_s16, 4  ;;  %s189_s21 = int_to_ptr.hbm [resolvable:$true] %s188_s21 }
  0x25   : > { %s980_s15 = sshra.s32 %s189_s21, 4  ;;  %s981_s15 = int_to_ptr.hbm [resolvable:$true] %s980_s15 }
  0x26   : > { %s982_s16 = scalar_lea.hbm %s981_s15, 16  ;;  %p988_p0 = scmp.lt.s32.totalorder %s981_s15, %s1395_s0 }
  0x27   : > { %p983_p2 = scmp.ne.s32.totalorder %s981_s15, %s982_s16  ;;  %p989_p3 = scmp.lt.s32.totalorder %s987_s6, %s982_s16 }
  0x29   : > { %p985_p12 = pnand %p984_p10, %p983_p2  ;;  %p990_p5 = por %p989_p3, %p988_p0 }
  0x2b   : > { %p986_p13 = pneg %p985_p12 }
  0x2d   : > { %p991_p11 = pnand %p990_p5, %p986_p13 }
  0x2f   : > { %994 = shalt.err (!%p991_p11)
}
  0x30   : > { %s1119_s11 = smov 256   ;;  %s1397_s12 = smov 8  }
  0x31   : > { %s1398_s7 = smov 128   ;;  %s204_s5 = scalar_lea.vmem [#allocation6], %s1226_s13 }
  0x32   : > { %893 = dma.hbm_to_vmem [thread:$0]  (!%p1234_p9), %s189_s21, 256, %s191_s25, %s180_s14, %s1119_s11, %s1398_s7, %s1397_s12  }
  0x33   : > { %s211_s24 = sshll.u32 %s204_s5, 4  ;;  %s200_s2 = sand.u32 1, %s1114_s20   ;;  %s212_s24 = int_to_ptr.vmem [resolvable:$true] %s211_s24 }
  0x34   : > { %s201_s28 = scalar_lea.sflag [#allocation7], %s200_s2  ;;  %s1010_s15 = sshra.s32 %s210_s8, 4  ;;  %s1011_s15 = int_to_ptr.hbm [resolvable:$true] %s1010_s15 }
  0x35   : > { %s1012_s6 = scalar_lea.hbm %s1011_s15, 16  ;;  %s1017_s0 = scalar_lea.hbm %s1379_s1, 32 }
  0x36   : > { %p1013_p2 = scmp.ne.s32.totalorder %s1011_s15, %s1012_s6  ;;  %p1018_p13 = scmp.lt.s32.totalorder %s1011_s15, %s1379_s1 }
  0x37   : > { %p1019_p0 = scmp.lt.s32.totalorder %s1017_s0, %s1012_s6 }
  0x38   : > { %p1015_p11 = pnand %p1013_p2, %p984_p10 }
  0x39   : > { %p1020_p3 = por %p1019_p0, %p1018_p13 }
  0x3a   : > { %p1016_p12 = pneg %p1015_p11 }
  0x3c   : > { %p1021_p5 = pnand %p1020_p3, %p1016_p12 }
  0x3e   : > { %1024 = shalt.err (!%p1021_p5)
}
  0x3f   : > { %896 = dma.hbm_to_vmem [thread:$0]  (!%p1234_p9), %s210_s8, 256, %s212_s24, %s201_s28, %s1119_s11, %s1398_s7, %s1397_s12  }
  0x40   : > { %223 = sbr.rel (%p1193_p8) target bundleno = 1418 (0x58a), region = 36  ;;  %s1274_s2 = sand.u32 (!%p1193_p8), 1, %s1106_s18  }
  0x41   : > { %s842_s9 = sshll.u32 (!%p1193_p8), %s1274_s2, 4  ;;  %s226_s13 = scalar_lea.sflag (!%p1193_p8), [#allocation4], %s1274_s2 }
  0x42   : > { %s229_s0 = scalar_lea.vmem (!%p1193_p8), [#allocation3], %s842_s9 }
  0x45   : > { %1085 = dma.done.wait (%p1180_p4), %s226_s13, 256  }
  0x46   : > { %1087 = vsyncadd (%p1180_p4), %s226_s13, 4294967040  ;;  %s235_s25 = sand.u32 1, %s1171_s3   ;;  %s239_s27 = scalar_lea.vmem [#allocation6], %s842_s9 }
  0x47   : > { %s236_s26 = scalar_lea.sflag [#allocation7], %s235_s25 }
  0x48   : > { %1089 = dma.done.wait (%p1180_p4), %s236_s26, 256  }
  0x49   : > { %1091 = vsyncadd (%p1180_p4), %s236_s26, 4294967040 }
  0x4a   : > { %1093 = dma.done.wait (%p45_p1), [#allocation7], 2304  }
  0x4b   : > { %1095 = vsyncadd (%p45_p1), [#allocation7], 4294964992  ;;  %v1120_v0 = vmov 32   ;;  %s277_s8 = sld [smem:[#allocation2]]  ;;  %v286_v1 = vld [vmem:[#allocation8 + $0x8] sm:$0x3] }
  0x4c   : > { %943 = vset.pattern.permute.xlu0 %v1120_v0  ;;  %944 = vset.pattern.permute.xlu1 %v1120_v0  ;;  %v276_v2 = vld [vmem:[%s229_s0 + $0x8] sm:$0xf]  ;;  %v275_v6 = vld [vmem:[%s229_s0] sm:$0xff]  ;;  %vm302_vm0 = vcmask 1043456   ;;  %vm297_vm1 = vcmask 97280   ;;  %s1121_s22 = smov 116  }
  0x4d   : > { %945 = vset.pattern.permute.xlu2 %v1120_v0  ;;  %v279_v3 = vld [vmem:[%s239_s27 + $0x8] sm:$0xf]  ;;  %294 = vperm.xlu0 %943, %v286_v1   ;;  %v278_v7 = vld [vmem:[%s239_s27] sm:$0xff]  ;;  %vm348_vm2 = vcmask 1041408   ;;  %vm343_vm3 = vcmask 80896   ;;  %vm425_vm4 = vcmask 1045504  }
  0x4e   : > { %v285_v11 = vld [vmem:[#allocation8] sm:$0xff]  ;;  %v1294_v12 = vld [vmem:[#allocation8 + $0x30] sm:$0xff]  ;;  %v1298_v13 = vld [vmem:[#allocation8 + $0x58] sm:$0xf]  ;;  %vm420_vm5 = vcmask 48128   ;;  %vm658_vm6 = vcmask 64512  }
  0x4f   : > { %v1301_v14 = vld [vmem:[#allocation8 + $0x68] sm:$0x3]  ;;  %v1305_v15 = vld [vmem:[#allocation8 + $0x70] sm:$0xff]  ;;  %v332_v16 = vld [vmem:[#allocation8 + $0x18] sm:$0x3]  ;;  %vm681_vm7 = vcmask 1044480  }
  0x50   : > { %340 = vperm.xlu1 %944, %v332_v16   ;;  %v331_v17 = vld [vmem:[#allocation8 + $0x10] sm:$0xff]  ;;  %v1308_v18 = vld [vmem:[#allocation8 + $0x48] sm:$0x3]  ;;  %v1315_v20 = vld [vmem:[#allocation8 + $0x80] sm:$0x1f]  ;;  %s845_s14 = sshll.u32 %s1274_s2, 3 }
  0x51   : > { %v280_v4 = vstv %s277_s8  ;;  %v1311_v19 = vld [vmem:[#allocation8 + $0x50] sm:$0xff]  ;;  %v377_v29 = vld [vmem:[#allocation8 + $0x20] sm:$0x3f]  ;;  %v409_v30 = vld [vmem:[#allocation8 + $0x38] sm:$0x3]  ;;  %s873_s11 = sshll.u32 %s1171_s3, 3 }
  0x52   : > { %v282_v5 = vmul.f32 %v280_v4, %v279_v3  ;;  %v281_v8 = vmul.f32 %v280_v4, %v278_v7  ;;  %380 = vperm.xlu2 %945, %v377_v29   ;;  %v454_v31 = vld [vmem:[#allocation8 + $0x40] sm:$0xff]  ;;  %s726_s5 = scalar_lea.hbm %s1382_s4, %s873_s11  ;;  %s274_s24 = scalar_lea.vmem [#allocation9], %s845_s14 }
  0x53   : > { %v540_v34 = vld [vmem:[#allocation8 + $0x60] sm:$0xff]  ;;  %s728_s28 = sshll.u32 %s274_s24, 4  ;;  %s730_s15 = sshll.u32 %s726_s5, 4  ;;  %s729_s28 = int_to_ptr.vmem [resolvable:$true] %s728_s28  ;;  %s731_s15 = int_to_ptr.hbm [resolvable:$true] %s730_s15 }
  0x54   : > { %v284_v9 = vadd.f32 %v282_v5, %v276_v2  ;;  %v283_v10 = vadd.f32 %v281_v8, %v275_v6  ;;  %s716_s3 = scalar_lea.sflag [#allocation5], %s1274_s2  ;;  %s1054_s6 = sshra.s32 %s731_s15, 4  ;;  %s1055_s6 = int_to_ptr.hbm [resolvable:$true] %s1054_s6 }
  0x55   : > { %289 = vperm.xlu0 %943, %v285_v11   ;;  %s1056_s16 = scalar_lea.hbm %s1055_s6, 8  ;;  %s1060_s9 = scalar_lea.hbm %s1382_s4, 16 }
  0x56   : > { %846 = vmatpush.msk.msra.mxu0 %vm302_vm0, %v284_v9  ;;  %p1057_p1 = scmp.ne.s32.totalorder %s1055_s6, %s1056_s16  ;;  %p1061_p9 = scmp.lt.s32.totalorder %s1055_s6, %s1382_s4 }
  0x57   : > { %p1062_p10 = scmp.lt.s32.totalorder %s1060_s9, %s1056_s16 }
  0x58   : > { %321 = vmatpush.msra.mxu0 %v283_v10  ;;  %335 = vperm.xlu1 %944, %v331_v17   ;;  %p1058_p4 = pnand %p1057_p1, %p1220_p7 }
  0x59   : > { %847 = vmatmul.msk.f32.vlgmr.msra.gmra.mxu0 %vm297_vm1, %v285_v11  ;;  %p1063_p2 = por %p1062_p10, %p1061_p9 }
  0x5a   : > { %863 = vmatpush.msk.msrb.mxu0 %vm302_vm0, %v276_v2  ;;  %417 = vperm.xlu2 %945, %v409_v30   ;;  %p1059_p8 = pneg %p1058_p4 }
  0x5c   : > { %570 = vmatpush.msrb.mxu0 %v275_v6  ;;  %p1064_p11 = pnand %p1063_p2, %p1059_p8 }
  0x5d   : > { %412 = vperm.xlu0 %943, %v1294_v12  }
  0x60   : > { %463 = vperm.xlu1 %944, %v1308_v18  }
  0x61   : > { %848 = vmatmul.msk.f32.gmra.mxu0 %vm297_vm1, %v286_v1 }
  0x62   : > { %458 = vperm.xlu2 %945, %v454_v31  }
  0x65   : > { %507 = vperm.xlu0 %943, %v1298_v13  }
  0x68   : > { %502 = vperm.xlu1 %944, %v1311_v19  }
  0x6a   : > { %544 = vrot.lane.b32.xlu2 %v540_v34, %s1121_s22 }
  0x6d   : > { %546 = vrot.lane.b32.xlu0 %v1301_v14, %s1121_s22 }
  0x70   : > { %613 = vperm.xlu1 %944, %v1301_v14  }
  0x72   : > { %609 = vperm.xlu2 %945, %v540_v34  }
  0x75   : > { %623 = vperm.xlu0 %943, %v1305_v15  }
  0x78   : > { %655 = vperm.xlu1 %944, %v1315_v20  }
  0xac   : > { %v381_v41 = vpop.permute.xlu2 %380 }
  0xb4   : > { %v418_v42 = vpop.permute.xlu2 %417 }
  0xbc   : > { %v459_v44 = vpop.permute.xlu2 %458 }
  0xbf   : > { %v295_v21 = vpop.permute.xlu0 %294 }
  0xc2   : > { %v341_v32 = vpop.permute.xlu1 %340 }
  0xc4   : > { %v545_v46 = vpop.permute.xlu2 %544 }
  0xc5   : > { %864 = vmatmul.msk.f32.vlgmr.msrb.gmra.mxu0 %vm297_vm1, %v545_v46 }
  0xc7   : > { %v290_v23 = vpop.permute.xlu0 %289 }
  0xca   : > { %v336_v35 = vpop.permute.xlu1 %335 }
  0xcc   : > { %v610_v11 = vpop.permute.xlu2 %609 }
  0xcf   : > { %v413_v43 = vpop.permute.xlu0 %412 }
  0xd2   : > { %v464_v57 = vpop.permute.xlu1 %463 }
  0xd6   : > { %v323_v22 = vpop.f32.mrf.mxu0 }
  0xd7   : > { %v324_v25 = vadd.f32 %v323_v22, %v290_v23  ;;  %v508_v45 = vpop.permute.xlu0 %507 }
  0xd9   : > { %v329_v28 = vmax.f32 %v324_v25, 0.0 }
  0xda   : > { %v503_v2 = vpop.permute.xlu1 %502 }
  0xde   : > { %v326_v24 = vpop.f32.mrf.mxu0 }
  0xdf   : > { %v327_v26 = vadd.f32 %v326_v24, %v295_v21  ;;  %v547_v47 = vpop.permute.xlu0 %546 }
  0xe0   : > { %865 = vmatmul.msk.f32.gmra.mxu0 %vm297_vm1, %v547_v47 }
  0xe1   : > { %v330_v27 = vmax.f32 %v327_v26, 0.0 }
  0xe2   : > { %v614_v10 = vpop.permute.xlu1 %613 }
  0xe3   : > { %849 = vmatpush.msk.msra.mxu1 %vm348_vm2, %v330_v27 }
  0xe5   : > { %367 = vmatpush.msra.mxu1 %v329_v28 }
  0xe6   : > { %850 = vmatmul.msk.f32.vlgmr.msra.gmra.mxu1 %vm343_vm3, %v331_v17 }
  0xea   : > { %v656_v22 = vpop.permute.xlu1 %655 }
  0xee   : > { %851 = vmatmul.msk.f32.gmra.mxu1 %vm343_vm3, %v332_v16 }
 0x142   : > { %v572_v4 = vpop.f32.mrf.mxu0 }
 0x15d   : > { %v575_v6 = vpop.f32.mrf.mxu0 }
 0x163   : > { %v369_v33 = vpop.f32.mrf.mxu1 }
 0x164   : > { %v370_v37 = vadd.f32 %v369_v33, %v336_v35 }
 0x166   : > { %v375_v40 = vmax.f32 %v370_v37, 0.0 }
 0x16b   : > { %v372_v36 = vpop.f32.mrf.mxu1 }
 0x16c   : > { %v373_v38 = vadd.f32 %v372_v36, %v341_v32 }
 0x16e   : > { %v376_v39 = vmax.f32 %v373_v38, 0.0 }
 0x170   : > { %852 = vmatpush.msk.msra.mxu2 %vm348_vm2, %v376_v39 }
 0x172   : > { %403 = vmatpush.msra.mxu2 %v375_v40 }
 0x173   : > { %853 = vmatmul.msk.f32.vlgmr.msra.gmra.mxu2 %vm343_vm3, %v377_v29 }
 0x1f6   : > { %v405_v48 = vpop.f32.mrf.mxu2 }
 0x1f7   : > { %v406_v49 = vadd.f32 %v405_v48, %v381_v41 }
 0x1f9   : > { %854 = vmatpush.msk.msra.mxu3 %vm425_vm4, %v406_v49 }
 0x1fa   : > { %855 = vmatmul.msk.f32.vlgmr.msra.gmra.mxu3 %vm420_vm5, %v1294_v12 }
 0x202   : > { %856 = vmatmul.msk.f32.gmra.mxu3 %vm420_vm5, %v409_v30 }
 0x27d   : > { %v446_v50 = vpop.f32.mrf.mxu3 }
 0x27e   : > { %v447_v52 = vadd.f32 %v446_v50, %v413_v43 }
 0x280   : > { %v452_v55 = vmax.f32 %v447_v52, 0.0 }
 0x285   : > { %v449_v51 = vpop.f32.mrf.mxu3 }
 0x286   : > { %v450_v53 = vadd.f32 %v449_v51, %v418_v42 }
 0x288   : > { %v453_v54 = vmax.f32 %v450_v53, 0.0 }
 0x28a   : > { %857 = vmatpush.msk.msrb.mxu2 %vm348_vm2, %v453_v54 }
 0x28c   : > { %488 = vmatpush.msrb.mxu2 %v452_v55 }
 0x28d   : > { %858 = vmatmul.msk.f32.vlgmr.msrb.gmra.mxu2 %vm343_vm3, %v454_v31 }
 0x295   : > { %859 = vmatmul.msk.f32.gmra.mxu2 %vm343_vm3, %v1308_v18  ;;  %v624_v18 = vpop.permute.xlu0 %623 }
 0x310   : > { %v490_v56 = vpop.f32.mrf.mxu2 }
 0x311   : > { %v491_v59 = vadd.f32 %v490_v56, %v459_v44 }
 0x313   : > { %v496_v62 = vmax.f32 %v491_v59, 0.0 }
 0x318   : > { %v493_v58 = vpop.f32.mrf.mxu2 }
 0x319   : > { %v494_v60 = vadd.f32 %v493_v58, %v464_v57 }
 0x31b   : > { %v497_v61 = vmax.f32 %v494_v60, 0.0 }
 0x31d   : > { %860 = vmatpush.msk.msrb.mxu3 %vm348_vm2, %v497_v61 }
 0x31f   : > { %532 = vmatpush.msrb.mxu3 %v496_v62 }
 0x320   : > { %861 = vmatmul.msk.f32.vlgmr.msrb.gmra.mxu3 %vm343_vm3, %v1311_v19 }
 0x328   : > { %862 = vmatmul.msk.f32.gmra.mxu3 %vm343_vm3, %v1298_v13 }
 0x3a3   : > { %v534_v63 = vpop.f32.mrf.mxu3 }
 0x3a4   : > { %v535_v3 = vadd.f32 %v534_v63, %v503_v2 }
 0x3ab   : > { %v537_v0 = vpop.f32.mrf.mxu3 }
 0x3ac   : > { %v538_v1 = vadd.f32 %v537_v0, %v508_v45 }
 0x3ae   : > { %866 = vmatpush.msk.msrb.mxu1 %vm302_vm0, %v538_v1 }
 0x3b0   : > { %600 = vmatpush.msrb.mxu1 %v535_v3 }
 0x3b1   : > { %867 = vmatmul.msk.f32.vlgmr.msrb.gmra.mxu1 %vm297_vm1, %v540_v34 }
 0x3b9   : > { %868 = vmatmul.msk.f32.gmra.mxu1 %vm297_vm1, %v1301_v14 }
 0x42e   : > { %v602_v5 = vpop.f32.mrf.mxu1 }
 0x42f   : > { %v603_v7 = vadd.f32 %v602_v5, %v572_v4 }
 0x431   : > { %v616_v12 = vadd.f32 %v610_v11, %v603_v7 }
 0x433   : > { %v618_v17 = vmax.f32 %v616_v12, 0.0 }
 0x436   : > { %v605_v8 = vpop.f32.mrf.mxu1 }
 0x437   : > { %v606_v9 = vadd.f32 %v605_v8, %v575_v6 }
 0x439   : > { %v617_v13 = vadd.f32 %v614_v10, %v606_v9 }
 0x43b   : > { %v619_v16 = vmax.f32 %v617_v13, 0.0 }
 0x43d   : > { %869 = vmatpush.msk.msra.mxu2 %vm348_vm2, %v619_v16 }
 0x43f   : > { %646 = vmatpush.msra.mxu2 %v618_v17 }
 0x440   : > { %870 = vmatmul.msk.f32.vlgmr.msra.gmra.mxu2 %vm343_vm3, %v1305_v15 }
 0x4c3   : > { %v648_v14 = vpop.f32.mrf.mxu2 }
 0x4c4   : > { %v649_v19 = vadd.f32 %v648_v14, %v624_v18 }
 0x4c6   : > { %v651_v21 = vmax.f32 %v649_v19, 0.0 }
 0x4c8   : > { %676 = vmatpush.msra.mxu3 %v651_v21 }
 0x4c9   : > { %871 = vmatmul.msk.f32.vlgmr.msra.gmra.mxu3 %vm658_vm6, %v1315_v20 }
 0x54c   : > { %v678_v23 = vpop.f32.mrf.mxu3 }
 0x54d   : > { %v679_v24 = vadd.f32 %v678_v23, %v656_v22 }
 0x54f   : > { %v682_v25 = vsel %vm681_vm7, %v679_v24, -inf }
 0x550   : > { %v683_v26 = vrot.slane %v682_v25, 4 }
 0x552   : > { %v684_v27 = vmax.f32 %v682_v25, %v683_v26 }
 0x554   : > { %v685_v28 = vrot.slane %v684_v27, 2 }
 0x556   : > { %v686_v29 = vmax.f32 %v684_v27, %v685_v28 }
 0x558   : > { %v687_v30 = vrot.slane %v686_v29, 1 }
 0x55a   : > { %v688_v15 = vmax.f32 %v686_v29, %v687_v30 }
 0x55c   : > { %v689_v31 = vsub.f32 %v679_v24, %v688_v15 }
 0x55e   : > { %v690_v32 = vmul.f32 1.442695, %v689_v31 }
 0x560   : > { %946 = vpow2.f32 %v690_v32 }
 0x566   : > { %v947_v33 = vpop.eup %946 }
 0x567   : > { %v692_v34 = vsel %vm681_vm7, %v947_v33, 0.0 }
 0x568   : > { %v693_v35 = vrot.slane %v692_v34, 4 }
 0x56a   : > { %v694_v20 = vadd.f32 %v693_v35, %v692_v34 }
 0x56c   : > { %v695_v36 = vrot.slane %v694_v20, 2 }
 0x56e   : > { %v696_v37 = vadd.f32 %v695_v36, %v694_v20 }
 0x570   : > { %v697_v38 = vrot.slane %v696_v37, 1 }
 0x572   : > { %v698_v39 = vadd.f32 %v697_v38, %v696_v37 }
 0x574   : > { %948 = vrcp.f32 %v698_v39  ;;  %v710_v43 = vand.u32 2147483648, %v698_v39  ;;  %v708_v45 = vand.u32 2147483647, %v698_v39  ;;  %vm704_vm9 = vweird.f32 %v698_v39 }
 0x576   : > { %v711_v47 = vor.u32 1.1754944e-38, %v710_v43  ;;  %vm709_vm11 = vcmp.eq.f32.partialorder %v708_v45, 8.507059e+37 }
 0x57a   : > { %v949_v40 = vpop.eup %948 }
 0x57b   : > { %v700_v41 = vmul.f32 %v949_v40, %v698_v39  ;;  %vm705_vm8 = vweird.f32 %v949_v40 }
 0x57c   : > { %vm706_vm10 = vmor %vm704_vm9, %vm705_vm8 }
 0x57d   : > { %v701_v42 = vsub.f32 1.0, %v700_v41 }
 0x57f   : > { %v702_v44 = vmul.f32 %v949_v40, %v701_v42 }
 0x581   : > { %v703_v46 = vadd.f32 %v949_v40, %v702_v44 }
 0x583   : > { %v707_v48 = vsel %vm706_vm10, %v949_v40, %v703_v46 }
 0x584   : > { %v712_v49 = vsel %vm709_vm11, %v711_v47, %v707_v48 }
 0x585   : > { %v713_v50 = vmul.f32 %v947_v33, %v712_v49 }
 0x587   : > { %714 = vst [vmem:[%s274_s24] sm:$0x1f] %v713_v50 }
 0x588   : > { %1067 = shalt.err (!%p1064_p11)
}
 0x589   : > { %884 = dma.vmem_to_hbm [thread:$0]  (%p1220_p7), %s729_s28, 128, %s731_s15, %s716_s3  }
 0x58a PF: > { %s742_s2 = sand.u32 1, %s1102_s17   ;;  %p1399_p12 = scmp.ge.s32.totalorder %s1114_s20, 2 }
 0x58b   : > { %s743_s25 = scalar_lea.sflag [#allocation5], %s742_s2 }
 0x58c   : > { %p898_p13 = pnand %p1399_p12, %p1185_p6 }
 0x58e   : > { %p899_p0 = pneg %p898_p13 }
 0x590   : > { %1097 = dma.done.wait (%p899_p0), %s743_s25, 128  }
 0x591   : > { %1099 = vsyncadd (%p899_p0), %s743_s25, 4294967168  ;;  %s1400_s26 = sld [smem:[#allocation14_spill]]  ;;  %p21_p3 = scmp.ge.s32.totalorder %s1203_s30, 4  }
 0x592   : > { %s1401_s17 = smov %s1106_s18  ;;  %s1402_s18 = smov %s1110_s19 }
 0x593   : > { %s1404_s20 = smov %s1203_s30  ;;  %23 = sbr.rel (!%p21_p3) target bundleno = 11 (0xb), region = 98 }
 0x597   : > { %s1403_s19 = smov %s1400_s26 }
 0x598   :  { %749 = vsyncpa [#allocation4], 1 }
 0x599   :  { %751 = vsyncpa [#allocation4 + $0x1], 1 }
 0x59a   :  { %752 = vsyncpa [#allocation7], 1 }
 0x59b   :  { %754 = vsyncpa [#allocation7 + $0x1], 1 }
 0x59c   :  { %755 = vsyncpa [#allocation5], 1 }
 0x59d   :  { %757 = vsyncpa [#allocation5 + $0x1], 1 }

</bundles_post_ra>
